<compile_context>
chip_gen: v6e
topology: v6e:2x2x1
jax: 0.10.0
libtpu: 0.0.40
codegen_flags: <defaults>
</compile_context>

<pallas_src>
import jax
import jax.numpy as jnp
from jax.experimental import pallas as pl
from jax.experimental.pallas import tpu as pltpu


def attention_kernel(x_ref, w_ref, b_ref, out_ref):
    # x_ref:   (Bb, T, H) lstm outputs, native dtype (bf16 or f32)
    # w_ref:   (1, H)     attention linear weight (nn.Linear(H, 1).weight)
    # b_ref:   (1,)       attention linear bias, SMEM scalar (f32)
    # out_ref: (Bb, H)    weighted output
    x = x_ref[...]                               # keep native dtype (no f32 slab)
    w = w_ref[...].astype(x.dtype)               # (1, H) -> broadcasts over (Bb, T, H)
    b = b_ref[0]                                 # scalar from SMEM

    # scores[b, t] = sum_h x[b, t, h] * w[h] + bias
    # VPU broadcast-multiply + lane reduction, f32 accumulation (no MXU matvec).
    scores = jnp.sum((x * w).astype(jnp.float32), axis=-1) + b          # (Bb, T)

    # Numerically-stable softmax over time (dim=1), in f32.
    m = jnp.max(scores, axis=1, keepdims=True)
    e = jnp.exp(scores - m)
    denom = jnp.sum(e, axis=1, keepdims=True)
    weights = e * pl.reciprocal(denom, approx=True)                     # (Bb, T)

    # out[b, h] = sum_t weights[b, t] * x[b, t, h]
    # VPU broadcast-multiply + sublane (T) reduction, f32 accumulation.
    out = jnp.sum(weights[:, :, None] * x.astype(jnp.float32), axis=1)  # (Bb, H)
    out_ref[...] = out.astype(out_ref.dtype)


def attention_forward(lstm_outputs, weight, bias, *, block_b=None):
    """lstm_outputs: (B, T, H); weight: (1, H); bias: (1,) -> (B, H)."""
    B, T, H = lstm_outputs.shape

    if block_b is None:
        # Largest batch tile that keeps 2x double-buffered (Bb, T, H) input
        # blocks modest; re-derive per generation (v7x has half of v6e's VMEM).
        block_b = B if B <= 256 else 256
    if block_b != B:
        # (8,128) rule: once we tile B, the output block's sublane dim must be
        # a multiple of 8 (full-extent blocks are exempt).
        block_b = max(8, (block_b // 8) * 8)
    grid = (pl.cdiv(B, block_b),)

    itemsize = jnp.dtype(lstm_outputs.dtype).itemsize
    cost = pl.CostEstimate(
        flops=4 * B * T * H,                       # two mul+add passes over x
        transcendentals=B * T,                     # exp in the softmax
        bytes_accessed=(B * T * H + B * H + H) * itemsize,
    )

    return pl.pallas_call(
        attention_kernel,
        out_shape=jax.ShapeDtypeStruct((B, H), lstm_outputs.dtype),
        grid=grid,
        in_specs=[
            pl.BlockSpec((block_b, T, H), lambda i: (i, 0, 0)),
            pl.BlockSpec((1, H), lambda i: (0, 0)),
            pl.BlockSpec(memory_space=pltpu.MemorySpace.SMEM),   # bias scalar
        ],
        out_specs=pl.BlockSpec((block_b, H), lambda i: (i, 0)),
        compiler_params=pltpu.CompilerParams(
            dimension_semantics=("parallel",),
            vmem_limit_bytes=32 * 1024 * 1024,
        ),
        cost_estimate=cost,
    )(lstm_outputs, weight, bias.astype(jnp.float32))


def reference_forward(lstm_outputs, weight, bias):
    """Plain-JAX reference mirroring the PyTorch module."""
    scores = jnp.einsum("bth,oh->bt", lstm_outputs, weight) + bias[0]   # (B, T)
    w = jax.nn.softmax(scores, axis=1)                                   # (B, T)
    return jnp.sum(lstm_outputs * w[..., None], axis=1)                  # (B, H)


if __name__ == "__main__":
    B, T, H = 2, 8, 32   # batch, seq, hidden

    key = jax.random.PRNGKey(0)
    kx, kw, kb = jax.random.split(key, 3)

    lstm_outputs = jax.random.normal(kx, (B, T, H), dtype=jnp.float32)

    # Deterministic parameter init matching nn.Linear(H, 1) shapes:
    # weight (1, H), bias (1,), uniform(-1/sqrt(H), 1/sqrt(H)).
    bound = 1.0 / jnp.sqrt(jnp.float32(H))
    weight = jax.random.uniform(kw, (1, H), jnp.float32, -bound, bound)
    bias = jax.random.uniform(kb, (1,), jnp.float32, -bound, bound)

    out = attention_forward(lstm_outputs, weight, bias)
    out = jax.block_until_ready(out)

    ref = reference_forward(lstm_outputs, weight, bias)
    assert out.shape == (B, H)
    # Tolerance covers the EUP approximate reciprocal in the softmax denominator.
    assert jnp.allclose(out, ref, atol=5e-3, rtol=5e-3), float(
        jnp.max(jnp.abs(out - ref))
    )

    print("KERNEL_OK")
</pallas_src>

<mosaic_0001>
module attributes {stable_mosaic.version = 11 : i64} {
  func.func @attention_kernel(%arg0: i32, %arg1: memref<2x8x32xf32, #tpu.memory_space<vmem>>, %arg2: memref<1x32xf32, #tpu.memory_space<vmem>>, %arg3: memref<1xf32, #tpu.memory_space<smem>>, %arg4: memref<2x32xf32, #tpu.memory_space<vmem>>) attributes {dimension_semantics = [#tpu.dimension_semantics<parallel>], iteration_bounds = array<i64: 1>, scalar_prefetch = 0 : i64, scratch_operands = 0 : i64, tpu.core_type = #tpu.core_type<tc>, window_params = [{transform_indices = @transform_0, window_bounds = array<i64: 2, 8, 32>}, {pipeline_mode = #tpu.pipeline_mode<synchronous>, transform_indices = @transform_1, window_bounds = array<i64: 1, 32>}, {transform_indices = @transform_2, window_bounds = array<i64: 1>}, {transform_indices = @transform_3, window_bounds = array<i64: 2, 32>}]} {
    %c0 = arith.constant 0 : index
    %c0_0 = arith.constant 0 : index
    %c0_1 = arith.constant 0 : index
    %0 = vector.load %arg1[%c0, %c0_0, %c0_1] : memref<2x8x32xf32, #tpu.memory_space<vmem>>, vector<2x8x32xf32>
    %c0_2 = arith.constant 0 : index
    %c0_3 = arith.constant 0 : index
    %1 = vector.load %arg2[%c0_2, %c0_3] : memref<1x32xf32, #tpu.memory_space<vmem>>, vector<1x32xf32>
    %c0_4 = arith.constant 0 : index
    %2 = memref.load %arg3[%c0_4] : memref<1xf32, #tpu.memory_space<smem>>
    %3 = vector.shape_cast %1 : vector<1x32xf32> to vector<1x1x32xf32>
    %4 = vector.broadcast %3 : vector<1x1x32xf32> to vector<2x8x32xf32>
    %5 = arith.mulf %0, %4 : vector<2x8x32xf32>
    %cst = arith.constant dense<0.000000e+00> : vector<2x8xf32>
    %6 = vector.multi_reduction <add>, %5, %cst [2] : vector<2x8x32xf32> to vector<2x8xf32>
    %7 = vector.broadcast %2 : f32 to vector<2x8xf32>
    %8 = arith.addf %6, %7 : vector<2x8xf32>
    %cst_5 = arith.constant dense<0xFF800000> : vector<2xf32>
    %9 = vector.multi_reduction <maximumf>, %8, %cst_5 [1] : vector<2x8xf32> to vector<2xf32>
    %10 = vector.shape_cast %9 : vector<2xf32> to vector<2x1xf32>
    %11 = vector.broadcast %10 : vector<2x1xf32> to vector<2x8xf32>
    %12 = arith.subf %8, %11 : vector<2x8xf32>
    %13 = math.exp %12 : vector<2x8xf32>
    %cst_6 = arith.constant dense<0.000000e+00> : vector<2xf32>
    %14 = vector.multi_reduction <add>, %13, %cst_6 [1] : vector<2x8xf32> to vector<2xf32>
    %15 = vector.shape_cast %14 : vector<2xf32> to vector<2x1xf32>
    %16 = tpu.reciprocal %15 {approx = true} : vector<2x1xf32> -> vector<2x1xf32>
    %17 = vector.broadcast %16 : vector<2x1xf32> to vector<2x8xf32>
    %18 = arith.mulf %13, %17 : vector<2x8xf32>
    %19 = vector.shape_cast %18 : vector<2x8xf32> to vector<2x8x1xf32>
    %20 = vector.broadcast %19 : vector<2x8x1xf32> to vector<2x8x32xf32>
    %21 = arith.mulf %20, %0 : vector<2x8x32xf32>
    %cst_7 = arith.constant dense<0.000000e+00> : vector<2x32xf32>
    %22 = vector.multi_reduction <add>, %21, %cst_7 [1] : vector<2x8x32xf32> to vector<2x32xf32>
    %c0_8 = arith.constant 0 : index
    %c0_9 = arith.constant 0 : index
    %23 = vector.load %arg4[%c0_8, %c0_9] : memref<2x32xf32, #tpu.memory_space<vmem>>, vector<2x32xf32>
    tpu.vector_store %arg4[%c0_8, %c0_9], %22 {strides = array<i32>} : memref<2x32xf32, #tpu.memory_space<vmem>>, vector<2x32xf32>,
    return
  }
  func.func @transform_0(%arg0: i32) -> (i32, i32, i32) {
    %c0_i32 = arith.constant 0 : i32
    %c0_i32_0 = arith.constant 0 : i32
    %c0_i32_1 = arith.constant 0 : i32
    return %arg0, %c0_i32, %c0_i32_0 : i32, i32, i32
  }
  func.func @transform_1(%arg0: i32) -> (i32, i32) {
    %c0_i32 = arith.constant 0 : i32
    %c0_i32_0 = arith.constant 0 : i32
    %c0_i32_1 = arith.constant 0 : i32
    return %c0_i32, %c0_i32_0 : i32, i32
  }
  func.func @transform_2(%arg0: i32) -> i32 {
    %c0_i32 = arith.constant 0 : i32
    %c0_i32_0 = arith.constant 0 : i32
    return %c0_i32 : i32
  }
  func.func @transform_3(%arg0: i32) -> (i32, i32) {
    %c0_i32 = arith.constant 0 : i32
    %c0_i32_0 = arith.constant 0 : i32
    return %arg0, %c0_i32 : i32, i32
  }
}

</mosaic_0001>

<bundles_post_ra>
// kernel: tpu_custom_call.1
= control target key start
LH: loop header
LB: loop body
LE: loop exit
PB: predicated region body
PF: predicated region fallthrough
CT: control target
= control target key end

     0   :  { %9 = vsyncpa [#allocation4], 0  ;;  %s274_s0 = inlined_call_operand.hbm [shape: f32[2,8,32], index: 0, kind: input, shape index: {}]   ;;  %s275_s1 = inlined_call_operand.vmem [shape: f32[1,32], index: 1, kind: input, shape index: {}]   ;;  %s276_s2 = inlined_call_operand.<no memory space> [shape: f32[1], index: 2, kind: input, shape index: {}]   ;;  %s277_s3 = inlined_call_operand.hbm [shape: f32[2,32], index: 3, kind: output, shape index: {}]  }
   0x1   :  { %10 = vsyncpa [#allocation5], 0  ;;  %s228_s12 = smov [#allocation3]  }
   0x2   :  { %s16_s13 = sshll.u32 %s228_s12, 4  ;;  %s17_s13 = int_to_ptr.vmem [resolvable:$true] %s16_s13 }
   0x3   :  { %s192_s14 = scalar_lea.vmem %s17_s13, 256  ;;  %p197_p1 = scmp.lt.s32.totalorder %s17_s13, %s17_s13 }
   0x4   :  { %p193_p0 = scmp.ne.s32.totalorder %s17_s13, %s192_s14  ;;  %p198_p2 = scmp.lt.s32.totalorder %s192_s14, %s192_s14 }
   0x6   :  { %p199_p3 = por %p198_p2, %p197_p1 }
   0x8   :  { %p200_p4 = pnand %p199_p3, %p193_p0 }
   0xa   :  { %203 = shalt.err (!%p200_p4)
}
   0xb   :  { %s229_s15 = smov 128   ;;  %s230_s16 = smov 8  }
   0xc   :  { %22 = dma.hbm_to_vmem [thread:$0]  %s274_s0, 256, %s17_s13, [#allocation4], %s229_s15, %s229_s15, %s230_s16  }
   0xd   :  { %224 = dma.done.wait [#allocation4], 256  }
   0xe   :  { %225 = vsyncadd [#allocation4], 4294967040  ;;  %v30_v0 = vld [vmem:[#allocation3] sm:$0xff]  ;;  %vm42_vm0 = vcmask 261120   ;;  %v31_v2 = vld [vmem:[#allocation3 + $0x8] sm:$0xff]  ;;  %v54_v7 = vlaneseq  ;;  %v49_v10 = vstv %s276_s2  ;;  %vm64_vm1 = vcmask 1041409  }
   0xf   :  { %v170_v1 = vld [vmem:[%s275_s1] ss:$0 sm:$0xff]  ;;  %vm67_vm2 = vcmask 58368   ;;  %v231_v20 = vmov 0   ;;  %s232_s1 = smov [#allocation6]   ;;  %vm153_vm3 = vcmask 254976  }
  0x10   :  { %v40_v3 = vmul.f32 %v170_v1, %v30_v0  ;;  %v41_v4 = vmul.f32 %v170_v1, %v31_v2  ;;  %v55_v8 = vand.u32 127, %v54_v7  ;;  %v57_v9 = vshrl.u32 %v54_v7, 7  ;;  %177 = vset.pattern.permute.xlu0 %v231_v20  ;;  %176 = vset.pattern.permute.xlu1 %v231_v20  ;;  %s161_s2 = sshll.u32 %s232_s1, 4  ;;  %s162_s2 = int_to_ptr.vmem [resolvable:$true] %s161_s2 }
  0x11   :  { %s204_s22 = scalar_lea.vmem %s162_s2, 32  ;;  %p209_p6 = scmp.lt.s32.totalorder %s162_s2, %s162_s2 }
  0x12   :  { %v43_v5 = vsel %vm42_vm0, %v40_v3, 0.0  ;;  %v46_v6 = vsel %vm42_vm0, %v41_v4, 0.0  ;;  %v58_v12 = vsub.s32 %v55_v8, %v57_v9  ;;  %v74_v21 = vsub.s32 0, %v57_v9  ;;  %p205_p5 = scmp.ne.s32.totalorder %s162_s2, %s204_s22  ;;  %p210_p7 = scmp.lt.s32.totalorder %s204_s22, %s204_s22 }
  0x13   :  { %44 = vadd.xlane.f32.xlu0 %v43_v5  ;;  %v78_v22 = vsub.s32 1, %v57_v9 }
  0x14   :  { %p211_p8 = por %p210_p7, %p209_p6 }
  0x16   :  { %p212_p9 = pnand %p211_p8, %p205_p5 }
  0x17   :  { %47 = vadd.xlane.f32.xlu0 %v46_v6 }
  0x9c   :  { %v45_v11 = vpop.xlane.xlu0 %44 }
  0x9d   :  { %v50_v13 = vadd.f32 %v49_v10, %v45_v11 }
  0x9f   :  { %v59_v16 = vrot.slane %v50_v13, %v58_v12 }
  0xa0   :  { %v48_v14 = vpop.xlane.xlu0 %47 }
  0xa1   :  { %v51_v15 = vadd.f32 %v49_v10, %v48_v14 }
  0xa3   :  { %v63_v17 = vrot.slane %v51_v15, %v58_v12 }
  0xa5   :  { %v65_v18 = vsel %vm64_vm1, %v63_v17, %v59_v16 }
  0xa6   :  { %v68_v19 = vsel %vm67_vm2, %v65_v18, -inf }
  0xa7   :  { %69 = vmax.xlane.f32.xlu1 %v68_v19 }
 0x130   :  { %v70_v23 = vpop.xlane.xlu1 %69 }
 0x131   :  { %v75_v24 = vrot.slane %v70_v23, %v74_v21  ;;  %v79_v25 = vrot.slane %v70_v23, %v78_v22 }
 0x133   :  { %v82_v26 = vsub.f32 %v50_v13, %v75_v24  ;;  %v83_v27 = vsub.f32 %v51_v15, %v79_v25 }
 0x135   :  { %v84_v28 = vmul.f32 1.442695, %v82_v26  ;;  %v86_v29 = vmul.f32 1.442695, %v83_v27 }
 0x137   :  { %178 = vpow2.f32 %v84_v28 }
 0x138   :  { %180 = vpow2.f32 %v86_v29 }
 0x144   :  { %v179_v30 = vpop.eup %178 }
 0x145   :  { %v181_v31 = vpop.eup %180  ;;  %91 = vperm.xlu1 %176, %v179_v30  }
 0x146   :  { %94 = vperm.xlu0 %177, %v181_v31  }
 0x1c0   :  { %v92_v32 = vpop.permute.xlu1 %91 }
 0x1c1   :  { %v95_v33 = vpop.permute.xlu0 %94  ;;  %v99_v34 = vrot.slane %v92_v32, %v58_v12 }
 0x1c2   :  { %v103_v35 = vrot.slane %v95_v33, %v58_v12 }
 0x1c4   :  { %v104_v36 = vsel %vm64_vm1, %v103_v35, %v99_v34 }
 0x1c5   :  { %v106_v37 = vsel %vm67_vm2, %v104_v36, 0.0 }
 0x1c6   :  { %107 = vadd.xlane.f32.xlu1 %v106_v37 }
 0x24f   :  { %v108_v38 = vpop.xlane.xlu1 %107 }
 0x250   :  { %182 = vrcp.f32 %v108_v38 }
 0x25d   :  { %v183_v39 = vpop.eup %182 }
 0x25e   :  { %v114_v40 = vrot.slane %v183_v39, %v74_v21  ;;  %v118_v42 = vrot.slane %v183_v39, %v78_v22 }
 0x260   :  { %v121_v41 = vmul.f32 %v179_v30, %v114_v40  ;;  %v122_v43 = vmul.f32 %v181_v31, %v118_v42 }
 0x262   :  { %125 = vperm.xlu0 %177, %v121_v41  }
 0x266   :  { %130 = vperm.xlu0 %177, %v122_v43  }
 0x2dd   :  { %v126_v44 = vpop.permute.xlu0 %125 }
 0x2de   :  { %v133_v45 = vmul.f32 %v126_v44, %v30_v0 }
 0x2e0   :  { %v135_v46 = vsel %vm42_vm0, %v133_v45, 0.0 }
 0x2e1   :  { %v136_v47 = vrot.slane %v135_v46, 4  ;;  %v131_v48 = vpop.permute.xlu0 %130 }
 0x2e2   :  { %v134_v49 = vmul.f32 %v131_v48, %v31_v2 }
 0x2e3   :  { %v137_v50 = vadd.f32 %v136_v47, %v135_v46 }
 0x2e4   :  { %v142_v51 = vsel %vm42_vm0, %v134_v49, 0.0 }
 0x2e5   :  { %v138_v52 = vrot.slane %v137_v50, 2  ;;  %v143_v53 = vrot.slane %v142_v51, 4 }
 0x2e7   :  { %v139_v54 = vadd.f32 %v138_v52, %v137_v50  ;;  %v144_v55 = vadd.f32 %v143_v53, %v142_v51 }
 0x2e9   :  { %v145_v56 = vrot.slane %v144_v55, 2  ;;  %v140_v57 = vrot.slane %v139_v54, 1 }
 0x2eb   :  { %v146_v58 = vadd.f32 %v145_v56, %v144_v55  ;;  %v141_v60 = vadd.f32 %v140_v57, %v139_v54 }
 0x2ed   :  { %v147_v59 = vrot.slane %v146_v58, 1 }
 0x2ef   :  { %v148_v61 = vadd.f32 %v147_v59, %v146_v58 }
 0x2f1   :  { %v151_v62 = vsel %vm64_vm1, %v148_v61, %v141_v60 }
 0x2f2   :  { %154 = vst.msk [vmem:[#allocation6] sm:$0x3] %vm153_vm3, %v151_v62 }
 0x2f3   :  { %215 = shalt.err (!%p212_p9)
}
 0x2f4   :  { %164 = dma.vmem_to_hbm [thread:$0]  %s162_s2, 32, %s277_s3, [#allocation5]  }
 0x2f5   :  { %226 = dma.done.wait [#allocation5], 32  }
 0x2f6   :  { %227 = vsyncadd [#allocation5], 4294967264 }
 0x2f7   :  { %168 = vsyncpa [#allocation4], 1 }
 0x2f8   :  { %169 = vsyncpa [#allocation5], 1 }

</bundles_post_ra>
